<compile_context>
chip_gen: v7x
topology: tpu7x:2x2x1
jax: 0.10.0
libtpu: 0.0.40
codegen_flags: <defaults>
</compile_context>

<pallas_src>
import math

import jax
import jax.numpy as jnp
from jax.experimental import pallas as pl
from jax.experimental.pallas import tpu as pltpu


def _round_up(v: int, m: int) -> int:
    return ((v + m - 1) // m) * m


def _default_vmem_limit() -> int:
    try:
        cap = pltpu.get_tpu_info().vmem_capacity_bytes
    except Exception:  # conservative fallback if the query is unavailable
        cap = 64 * 1024 * 1024
    return int(cap * 0.75)


def _choose_config(B, Npad, D_rhs, Dpad, adj_isz, out_isz, w_bytes, cdt_isz,
                   budget, batch_tile, row_tile, k_tile):
    """Pick (Bt, tm, tk, rhs_resident) under a VMEM budget."""
    tm = row_tile or next((t for t in (512, 256, 128) if Npad % t == 0), Npad)
    tk = k_tile or next((t for t in (512, 256, 128) if Npad % t == 0), Npad)
    Bt = batch_tile or next((b for b in (8, 4, 2, 1) if B % b == 0), 1)
    assert B % Bt == 0 and Npad % tm == 0 and Npad % tk == 0

    def vmem_bytes(bt, t_m, t_k, resident):
        rhs_rows = Npad if resident else t_k
        return (bt * t_m * t_k * adj_isz * 2            # adj blocks (double-buffered)
                + bt * rhs_rows * D_rhs * cdt_isz * 2   # rhs blocks
                + bt * t_m * Dpad * out_isz * 2         # output blocks
                + bt * t_m * D_rhs * 4                  # f32 accumulator scratch
                + w_bytes * 2)                          # resident weight (reorder path)

    # Keep rhs VMEM-resident (one DMA per batch tile) if it leaves >= half the
    # budget for adj / output / accumulator blocks.
    resident = Bt * Npad * D_rhs * cdt_isz * 2 <= budget // 2

    if batch_tile is None:
        while Bt > 1 and vmem_bytes(Bt, tm, tk, resident) > budget:
            Bt //= 2
    if k_tile is None:
        while tk > 128 and Npad % (tk // 2) == 0 and vmem_bytes(Bt, tm, tk, resident) > budget:
            tk //= 2
    if row_tile is None:
        while tm > 128 and Npad % (tm // 2) == 0 and vmem_bytes(Bt, tm, tk, resident) > budget:
            tm //= 2
    if resident and vmem_bytes(Bt, tm, tk, True) > budget:
        resident = False

    # v7x has two TensorCores: keep at least two units of "parallel" grid work
    # (B/Bt * Npad/tm) whenever the problem allows it.
    while batch_tile is None and Bt > 1 and (B // Bt) * (Npad // tm) < 2:
        Bt //= 2
    while (row_tile is None and tm > 128 and Npad % (tm // 2) == 0
           and (B // Bt) * (Npad // tm) < 2):
        tm //= 2

    return Bt, tm, tk, resident


def _make_gcn_kernel(reorder, rhs_resident, tk, compute_dtype):
    def accumulate(rhs_ref, adj_ref, acc_ref):
        k = pl.program_id(2)

        @pl.when(k == 0)
        def _():
            acc_ref[...] = jnp.zeros_like(acc_ref)

        adj = adj_ref[...].astype(compute_dtype)            # (Bt, tm, tk)
        if rhs_resident:
            start = pl.multiple_of(k * tk, tk)
            rhs = rhs_ref[:, pl.ds(start, tk), :]           # (Bt, tk, D), bf16
        else:
            rhs = rhs_ref[...]                              # (Bt, tk, D), bf16
        acc_ref[...] += jnp.einsum("bmk,bkd->bmd", adj, rhs,
                                   preferred_element_type=jnp.float32)

    if reorder:
        def kernel(rhs_ref, adj_ref, w_ref, o_ref, acc_ref):
            accumulate(rhs_ref, adj_ref, acc_ref)

            @pl.when(pl.program_id(2) == pl.num_programs(2) - 1)
            def _():
                bt, tm_, dk = acc_ref.shape
                tmp = acc_ref[...].astype(compute_dtype).reshape(bt * tm_, dk)
                out = jnp.dot(tmp, w_ref[...],
                              preferred_element_type=jnp.float32)
                o_ref[...] = jnp.maximum(out.reshape(o_ref.shape),
                                         0.0).astype(o_ref.dtype)
    else:
        def kernel(rhs_ref, adj_ref, o_ref, acc_ref):
            accumulate(rhs_ref, adj_ref, acc_ref)

            @pl.when(pl.program_id(2) == pl.num_programs(2) - 1)
            def _():
                o_ref[...] = jnp.maximum(acc_ref[...], 0.0).astype(o_ref.dtype)

    return kernel


def graph_convolution_batch(x, adj, weight, *, compute_dtype=jnp.bfloat16,
                            batch_tile=None, row_tile=None, k_tile=None,
                            vmem_limit_bytes=None):
    """Pallas forward of GraphConvolutionbatch (eval mode: dropout == identity).

    x:      (B, N, Din) float32
    adj:    (B, N, N)   float32 (or bf16 if the caller pre-cast a reused adj)
    weight: (Din, Dout) float32
    returns (B, N, Dout) in x.dtype
    """
    # TODO(synk): F.dropout(training=True) path not implemented; eval mode only.
    B, N, Din = x.shape
    Din_w, Dout = weight.shape
    assert Din_w == Din, (Din_w, Din)
    assert adj.shape == (B, N, N), adj.shape

    Npad = max(128, _round_up(N, 128))
    Dpad = max(128, _round_up(Dout, 128))
    Dinp = max(128, _round_up(Din, 128))

    # Reorder to (adj @ x) @ W only when it shrinks the MXU-padded width of the
    # dominant (B, N, N) matmul; tie -> keep the reference order adj @ (x @ W).
    reorder = Dinp < Dpad

    if reorder:
        rhs = x
        if Npad != N or Dinp != Din:
            rhs = jnp.pad(rhs, ((0, 0), (0, Npad - N), (0, Dinp - Din)))
        rhs = rhs.astype(compute_dtype)
        w_pad = weight
        if Dinp != Din or Dpad != Dout:
            w_pad = jnp.pad(w_pad, ((0, Dinp - Din), (0, Dpad - Dout)))
        w_pad = w_pad.astype(compute_dtype)
        D_rhs = Dinp
    else:
        # support = x @ W computed once here (plain XLA matmul); the kernel only
        # does the big adj @ support contraction + fused ReLU.
        support = jnp.einsum("bnd,do->bno", x, weight,
                             preferred_element_type=jnp.float32)
        rhs = support
        if Npad != N or Dpad != Dout:
            rhs = jnp.pad(rhs, ((0, 0), (0, Npad - N), (0, Dpad - Dout)))
        rhs = rhs.astype(compute_dtype)
        w_pad = None
        D_rhs = Dpad

    adj_p = adj if Npad == N else jnp.pad(
        adj, ((0, 0), (0, Npad - N), (0, Npad - N)))

    if vmem_limit_bytes is None:
        vmem_limit_bytes = _default_vmem_limit()
    budget = int(vmem_limit_bytes * 0.85)

    cdt_isz = jnp.dtype(compute_dtype).itemsize
    adj_isz = adj_p.dtype.itemsize
    out_isz = jnp.dtype(x.dtype).itemsize
    w_bytes = D_rhs * Dpad * cdt_isz if reorder else 0

    Bt, tm, tk, resident = _choose_config(
        B, Npad, D_rhs, Dpad, adj_isz, out_isz, w_bytes, cdt_isz, budget,
        batch_tile, row_tile, k_tile)

    grid = (B // Bt, Npad // tm, Npad // tk)
    kernel = _make_gcn_kernel(reorder, resident, tk, compute_dtype)

    if resident:
        # Block index ignores m and k -> fetched once per batch tile.
        rhs_spec = pl.BlockSpec((Bt, Npad, D_rhs), lambda b, m, k: (b, 0, 0))
    else:
        rhs_spec = pl.BlockSpec((Bt, tk, D_rhs), lambda b, m, k: (b, k, 0))
    adj_spec = pl.BlockSpec((Bt, tm, tk), lambda b, m, k: (b, m, k))
    out_spec = pl.BlockSpec((Bt, tm, Dpad), lambda b, m, k: (b, m, 0))

    in_specs = [rhs_spec, adj_spec]
    operands = [rhs, adj_p]
    if reorder:
        in_specs.append(pl.BlockSpec((D_rhs, Dpad), lambda b, m, k: (0, 0)))
        operands.append(w_pad)

    flops = 2 * B * Npad * Npad * D_rhs
    if reorder:
        flops += 2 * B * Npad * D_rhs * Dpad
    bytes_accessed = (rhs.size * cdt_isz + adj_p.size * adj_isz
                      + B * Npad * Dpad * out_isz + w_bytes)
    cost = pl.CostEstimate(flops=int(flops), transcendentals=0,
                           bytes_accessed=int(bytes_accessed))

    out_pad = pl.pallas_call(
        kernel,
        out_shape=jax.ShapeDtypeStruct((B, Npad, Dpad), x.dtype),
        grid_spec=pltpu.PrefetchScalarGridSpec(
            num_scalar_prefetch=0,
            grid=grid,
            in_specs=in_specs,
            out_specs=out_spec,
            scratch_shapes=[pltpu.VMEM((Bt, tm, D_rhs), jnp.float32)],
        ),
        compiler_params=pltpu.CompilerParams(
            dimension_semantics=("parallel", "parallel", "arbitrary"),
            vmem_limit_bytes=int(vmem_limit_bytes),
        ),
        cost_estimate=cost,
    )(*operands)

    if Npad != N or Dpad != Dout:
        out_pad = out_pad[:, :N, :Dout]
    return out_pad


def xavier_uniform(key, fan_in, fan_out, dtype=jnp.float32):
    # Matches nn.init.xavier_uniform_ (gain=1).
    bound = math.sqrt(6.0 / (fan_in + fan_out))
    return jax.random.uniform(
        key, (fan_in, fan_out), dtype=dtype, minval=-bound, maxval=bound)


if __name__ == "__main__":
    key = jax.random.PRNGKey(0)

    def run_case(case_key, B, N, Din, Dout):
        k_x, k_adj, k_w = jax.random.split(case_key, 3)
        x = jax.random.normal(k_x, (B, N, Din), dtype=jnp.float32)
        adj_raw = jax.random.uniform(k_adj, (B, N, N), dtype=jnp.float32)
        adj = (adj_raw + jnp.swapaxes(adj_raw, 1, 2)) / (2.0 * N)
        weight = xavier_uniform(k_w, Din, Dout)

        out = jax.block_until_ready(graph_convolution_batch(x, adj, weight))

        # Reference in plain f32 JAX; kernel uses bf16 operands with f32
        # accumulation (and a reassociated matmul order on the reorder path),
        # so the tolerance is loose.
        ref = jnp.maximum(jnp.einsum("bnm,bmd,do->bno", adj, x, weight), 0.0)
        assert out.shape == (B, N, Dout)
        err = float(jnp.max(jnp.abs(out - ref)))
        assert jnp.allclose(out, ref, atol=5e-2, rtol=5e-2), err

    k1, k2 = jax.random.split(key)
    run_case(k1, B=2, N=16, Din=8, Dout=32)     # non-reorder path: adj @ (x @ W)
    run_case(k2, B=2, N=16, Din=256, Dout=32)   # reorder path:     (adj @ x) @ W
    print("KERNEL_OK")
</pallas_src>

<mosaic_0001>
module attributes {stable_mosaic.version = 11 : i64} {
  func.func @kernel(%arg0: i32, %arg1: i32, %arg2: i32, %arg3: memref<1x128x128xbf16, #tpu.memory_space<vmem>>, %arg4: memref<1x128x128xf32, #tpu.memory_space<vmem>>, %arg5: memref<1x128x128xf32, #tpu.memory_space<vmem>>, %arg6: memref<1x128x128xf32, #tpu.memory_space<vmem>>) attributes {dimension_semantics = [#tpu.dimension_semantics<parallel>, #tpu.dimension_semantics<parallel>, #tpu.dimension_semantics<arbitrary>], iteration_bounds = array<i64: 2, 1, 1>, scalar_prefetch = 0 : i64, scratch_operands = 1 : i64, tpu.core_type = #tpu.core_type<tc>, window_params = [{transform_indices = @transform_0, window_bounds = array<i64: 1, 128, 128>}, {transform_indices = @transform_1, window_bounds = array<i64: 1, 128, 128>}, {transform_indices = @transform_2, window_bounds = array<i64: 1, 128, 128>}]} {
    %c0_i32 = arith.constant 0 : i32
    %0 = arith.cmpi eq, %arg2, %c0_i32 : i32
    %1 = arith.extui %0 : i1 to i32
    %c0_i32_0 = arith.constant 0 : i32
    %2 = arith.cmpi ne, %1, %c0_i32_0 : i32
    scf.if %2 {
      %cst_13 = arith.constant 0.000000e+00 : f32
      %16 = vector.broadcast %cst_13 : f32 to vector<1x128x128xf32>
      %c0_14 = arith.constant 0 : index
      %c0_15 = arith.constant 0 : index
      %c0_16 = arith.constant 0 : index
      %17 = vector.load %arg6[%c0_14, %c0_15, %c0_16] : memref<1x128x128xf32, #tpu.memory_space<vmem>>, vector<1x128x128xf32>
      tpu.vector_store %arg6[%c0_14, %c0_15, %c0_16], %16 {strides = array<i32>} : memref<1x128x128xf32, #tpu.memory_space<vmem>>, vector<1x128x128xf32>,
    } else {
    }
    %c0 = arith.constant 0 : index
    %c0_1 = arith.constant 0 : index
    %c0_2 = arith.constant 0 : index
    %3 = vector.load %arg4[%c0, %c0_1, %c0_2] : memref<1x128x128xf32, #tpu.memory_space<vmem>>, vector<1x128x128xf32>
    %4 = arith.truncf %3 : vector<1x128x128xf32> to vector<1x128x128xbf16>
    %c128_i32 = arith.constant 128 : i32
    %5 = arith.muli %arg2, %c128_i32 : i32
    %6 = tpu.assume_multiple %5, 128 : i32
    %c0_3 = arith.constant 0 : index
    %7 = arith.index_cast %6 : i32 to index
    %c0_4 = arith.constant 0 : index
    %8 = vector.load %arg3[%c0_3, %7, %c0_4] : memref<1x128x128xbf16, #tpu.memory_space<vmem>>, vector<1x128x128xbf16>
    %c0_5 = arith.constant 0 : index
    %c0_6 = arith.constant 0 : index
    %c0_7 = arith.constant 0 : index
    %9 = vector.load %arg6[%c0_5, %c0_6, %c0_7] : memref<1x128x128xf32, #tpu.memory_space<vmem>>, vector<1x128x128xf32>
    "tpu.trace_start"() <{level = 10 : i32, message = "bmk,bkd->bmd"}> : () -> ()
    %cst = arith.constant dense<0.000000e+00> : vector<1x128x128xf32>
    %10 = tpu.matmul %4, %8, %cst {dimension_numbers = #tpu.dot_dimension_numbers<[2], [1], [1], [2], [0, 0, 0, 1, 1, 2], [0], [0]>} : vector<1x128x128xbf16>, vector<1x128x128xbf16>, vector<1x128x128xf32> -> vector<1x128x128xf32>
    "tpu.trace_stop"() : () -> ()
    %11 = arith.addf %9, %10 : vector<1x128x128xf32>
    %c0_8 = arith.constant 0 : index
    %c0_9 = arith.constant 0 : index
    %c0_10 = arith.constant 0 : index
    %12 = vector.load %arg6[%c0_8, %c0_9, %c0_10] : memref<1x128x128xf32, #tpu.memory_space<vmem>>, vector<1x128x128xf32>
    tpu.vector_store %arg6[%c0_8, %c0_9, %c0_10], %11 {strides = array<i32>} : memref<1x128x128xf32, #tpu.memory_space<vmem>>, vector<1x128x128xf32>,
    %c0_i32_11 = arith.constant 0 : i32
    %13 = arith.cmpi eq, %arg2, %c0_i32_11 : i32
    %14 = arith.extui %13 : i1 to i32
    %c0_i32_12 = arith.constant 0 : i32
    %15 = arith.cmpi ne, %14, %c0_i32_12 : i32
    scf.if %15 {
      %c0_13 = arith.constant 0 : index
      %c0_14 = arith.constant 0 : index
      %c0_15 = arith.constant 0 : index
      %16 = vector.load %arg6[%c0_13, %c0_14, %c0_15] : memref<1x128x128xf32, #tpu.memory_space<vmem>>, vector<1x128x128xf32>
      %cst_16 = arith.constant 0.000000e+00 : f32
      %17 = vector.broadcast %cst_16 : f32 to vector<1x128x128xf32>
      %18 = arith.maximumf %16, %17 : vector<1x128x128xf32>
      %c0_17 = arith.constant 0 : index
      %c0_18 = arith.constant 0 : index
      %c0_19 = arith.constant 0 : index
      %19 = vector.load %arg5[%c0_17, %c0_18, %c0_19] : memref<1x128x128xf32, #tpu.memory_space<vmem>>, vector<1x128x128xf32>
      tpu.vector_store %arg5[%c0_17, %c0_18, %c0_19], %18 {strides = array<i32>} : memref<1x128x128xf32, #tpu.memory_space<vmem>>, vector<1x128x128xf32>,
    } else {
    }
    return
  }
  func.func @transform_0(%arg0: i32, %arg1: i32, %arg2: i32) -> (i32, i32, i32) {
    %c0_i32 = arith.constant 0 : i32
    %c0_i32_0 = arith.constant 0 : i32
    %c0_i32_1 = arith.constant 0 : i32
    return %arg0, %c0_i32, %c0_i32_0 : i32, i32, i32
  }
  func.func @transform_1(%arg0: i32, %arg1: i32, %arg2: i32) -> (i32, i32, i32) {
    %c0_i32 = arith.constant 0 : i32
    return %arg0, %arg1, %arg2 : i32, i32, i32
  }
  func.func @transform_2(%arg0: i32, %arg1: i32, %arg2: i32) -> (i32, i32, i32) {
    %c0_i32 = arith.constant 0 : i32
    %c0_i32_0 = arith.constant 0 : i32
    return %arg0, %arg1, %c0_i32 : i32, i32, i32
  }
}

</mosaic_0001>

<bundles_post_ra>
// kernel: tpu_custom_call.1
= control target key start
LH: loop header
LB: loop body
LE: loop exit
PB: predicated region body
PF: predicated region fallthrough
CT: control target
= control target key end

     0   :  { %7 = vsyncpa [#allocation4], 0  ;;  %s1297_s0 = inlined_call_operand.hbm [shape: bf16[2,128,128], index: 0, kind: input, shape index: {}]   ;;  %s1298_s1 = inlined_call_operand.hbm [shape: f32[2,128,128], index: 1, kind: input, shape index: {}]   ;;  %s1299_s2 = inlined_call_operand.hbm [shape: f32[2,128,128], index: 2, kind: output, shape index: {}]  }
   0x1   :  { %9 = vsyncpa [#allocation4 + $0x1], 0 }
   0x2   :  { %10 = vsyncpa [#allocation7], 0 }
   0x3   :  { %12 = vsyncpa [#allocation7 + $0x1], 0 }
   0x4   :  { %13 = vsyncpa [#allocation5], 0 }
   0x5   :  { %15 = vsyncpa [#allocation5 + $0x1], 0  ;;  %s1021_s9 = smov 0   ;;  %s1023_s10 = smov 0  }
   0x6   :  { %s1025_s11 = smov 0   ;;  %s1027_s12 = smov 0  }
   0x7   :  { %s1029_s13 = smov 0   ;;  %s1031_s14 = smov 0  }
   0x8 LB: > { %s674_s15 = sadd.s32 4294967295, %s995_s14   ;;  %s675_s16 = sadd.s32 4294967294, %s995_s14   ;;  %s995_s14 = sphi %s1031_s14, %s21_s14   ;;  %s991_s13 = sphi %s1029_s13, %s1317_s13   ;;  %s987_s12 = sphi %s1027_s12, %s1316_s12   ;;  %s983_s11 = sphi %s1025_s11, %s1315_s11   ;;  %s979_s10 = sphi %s1023_s10, %s1314_s10   ;;  %s975_s9 = sphi %s1021_s9, %s1313_s9  }
   0x9   : > { %s40_s17 = sadd.s32 1, %s991_s13  ;;  %s47_s18 = sadd.s32 1, %s983_s11 }
   0xa   : > { %p42_p0 = scmp.ge.s32.totalorder %s40_s17, 2  ;;  %p54_p1 = scmp.ne.s32.totalorder %s983_s11, %s979_s10 }
   0xb   : > { %p55_p2 = scmp.eq.s32.totalorder %s995_s14, 0  ;;  %p60_p3 = scmp.ne.s32.totalorder %s979_s10, %s975_s9 }
   0xc   : > { %s1319_s17 = smov (%p42_p0, %s40_s17), 0  ;;  %p61_p5 = scmp.eq.s32.totalorder %s674_s15, 0 }
   0xd   : > { %p1062_p4 = por %p55_p2, %p54_p1  ;;  %s44_s20 = ssub.s32 %s991_s13, %s1319_s17 }
   0xe   : > { %p116_p6 = scmp.eq.s32.totalorder %s674_s15, 1  ;;  %p45_p7 = scmp.eq.s32.totalorder %s44_s20, 0 }
   0xf   : > { %p1068_p8 = por %p61_p5, %p60_p3  ;;  %p122_p10 = scmp.eq.s32.totalorder %s675_s16, 1 }
  0x10   : > { %p1072_p9 = por %p116_p6, %p54_p1  ;;  %p785_p13 = scmp.lt.s32.totalorder %s995_s14, 2 }
  0x11   : > { %s1303_s21 = scalar_select %p1068_p8, 1, 0 }
  0x12   : > { %s1304_s22 = scalar_select %p1072_p9, 1, 0 }
  0x13   : > { %s1077_s23 = scalar_select %p45_p7, %s983_s11, %s47_s18  }
  0x14   : > { %p1079_p11 = por %p122_p10, %p60_p3  ;;  %s1086_s25 = sand.u32 1, %s983_s11  }
  0x15   : > { %s678_s26 = sshll.u32 %s1086_s25, 6  ;;  %s701_s27 = sshll.u32 %s991_s13, 10 }
  0x16   : > { %s1305_s24 = scalar_select %p1079_p11, 1, 0 }
  0x17   : > { %s1093_s30 = scalar_lea.hbm %s1297_s0, %s701_s27  ;;  %s146_s3 = scalar_lea.vmem [#allocation3], %s678_s26 }
  0x18   : > { %s153_s4 = sshll.u32 %s146_s3, 4  ;;  %p1099_p0 = pnand %p785_p13, %p1062_p4  ;;  %s1095_s4 = int_to_ptr.vmem [resolvable:$true] %s153_s4 }
  0x19   : > { %s143_s6 = scalar_lea.sflag [#allocation4], %s1086_s25  ;;  %s849_s7 = scalar_lea.hbm %s1093_s30, 1024 }
  0x1a   : > { %p850_p2 = scmp.ne.s32.totalorder %s1093_s30, %s849_s7  ;;  %p851_p3 = pneg %p1099_p0 }
  0x1b   : > { %s854_s16 = scalar_lea.hbm %s1297_s0, 2048  ;;  %p855_p4 = scmp.lt.u32.totalorder %s1093_s30, %s1297_s0 }
  0x1c   : > { %p852_p5 = pnand %p851_p3, %p850_p2  ;;  %p856_p7 = scmp.lt.u32.totalorder %s854_s16, %s849_s7 }
  0x1d   : > { %p858_p13 = scmp.lt.u32.totalorder %s849_s7, %s1093_s30 }
  0x1e   : > { %p853_p6 = pneg %p852_p5  ;;  %p857_p10 = por %p856_p7, %p855_p4 }
  0x20   : > { %p859_p12 = por %p858_p13, %p857_p10 }
  0x22   : > { %p860_p1 = pnand %p859_p12, %p853_p6 }
  0x24   : > { %863 = shalt.err (!%p860_p1)
}
  0x25   : > { %s864_s20 = scalar_lea.vmem %s1095_s4, 1024  ;;  %s997_s26 = smov [#allocation3]  }
  0x26   : > { %p865_p2 = scmp.ne.s32.totalorder %s1095_s4, %s864_s20  ;;  %s869_s27 = sshll.u32 %s997_s26, 4  ;;  %s870_s27 = int_to_ptr.vmem [resolvable:$false] %s869_s27 }
  0x27   : > { %s871_s28 = scalar_lea.vmem %s870_s27, 2048  ;;  %p872_p9 = scmp.lt.s32.totalorder %s1095_s4, %s870_s27 }
  0x28   : > { %p867_p5 = pnand %p865_p2, %p851_p3  ;;  %p873_p4 = scmp.lt.s32.totalorder %s871_s28, %s864_s20 }
  0x2a   : > { %p868_p11 = pneg %p867_p5  ;;  %p874_p7 = por %p873_p4, %p872_p9 }
  0x2c   : > { %p875_p10 = pnand %p874_p7, %p868_p11 }
  0x2e   : > { %878 = shalt.err (!%p875_p10)
}
  0x2f   : > { %s998_s29 = smov 64   ;;  %s999_s3 = smov 4  }
  0x30   : > { %777 = dma.hbm_to_vmem [thread:$0]  (!%p1099_p0), %s1093_s30, 1024, %s1095_s4, %s143_s6, %s998_s29, %s998_s29, %s999_s3  }
  0x31   : > { %p185_p12 = scmp.lt.s32.totalorder %s995_s14, 3  ;;  %s681_s7 = sshll.u32 %s1086_s25, 7 }
  0x32   : > { %s702_s8 = sshll.u32 %s991_s13, 11  ;;  %p1307_p9 = scmp.ge.s32.totalorder %s995_s14, 1 }
  0x33   : > { %s1144_s19 = scalar_lea.hbm %s1298_s1, %s702_s8  ;;  %s167_s20 = scalar_lea.vmem [#allocation6], %s681_s7 }
  0x34   : > { %p1137_p11 = pnand %p1307_p9, %p185_p12  ;;  %s177_s26 = sshll.u32 %s167_s20, 4  ;;  %s1146_s26 = int_to_ptr.vmem [resolvable:$true] %s177_s26 }
  0x35   : > { %s164_s30 = scalar_lea.sflag [#allocation7], %s1086_s25  ;;  %s879_s4 = scalar_lea.hbm %s1144_s19, 2048 }
  0x36   : > { %p880_p1 = scmp.ne.s32.totalorder %s1144_s19, %s879_s4  ;;  %s884_s28 = scalar_lea.hbm %s1298_s1, 4096 }
  0x37   : > { %p885_p2 = scmp.lt.u32.totalorder %s1144_s19, %s1298_s1  ;;  %p886_p5 = scmp.lt.u32.totalorder %s884_s28, %s879_s4 }
  0x38   : > { %p882_p6 = pnand %p880_p1, %p851_p3  ;;  %p888_p7 = scmp.lt.u32.totalorder %s879_s4, %s1144_s19 }
  0x39   : > { %p887_p4 = por %p886_p5, %p885_p2 }
  0x3a   : > { %p883_p13 = pneg %p882_p6 }
  0x3b   : > { %p889_p10 = por %p888_p7, %p887_p4 }
  0x3d   : > { %p890_p12 = pnand %p889_p10, %p883_p13 }
  0x3f   : > { %893 = shalt.err (!%p890_p12)
}
  0x40   : > { %s894_s7 = scalar_lea.vmem %s1146_s26, 2048  ;;  %s1000_s8 = smov [#allocation6]  }
  0x41   : > { %p895_p9 = scmp.ne.s32.totalorder %s1146_s26, %s894_s7  ;;  %s899_s16 = sshll.u32 %s1000_s8, 4  ;;  %s900_s16 = int_to_ptr.vmem [resolvable:$false] %s899_s16 }
  0x42   : > { %s901_s18 = scalar_lea.vmem %s900_s16, 4096  ;;  %p902_p8 = scmp.lt.s32.totalorder %s1146_s26, %s900_s16 }
  0x43   : > { %p897_p1 = pnand %p895_p9, %p851_p3  ;;  %p903_p2 = scmp.lt.s32.totalorder %s901_s18, %s894_s7 }
  0x45   : > { %p898_p6 = pneg %p897_p1  ;;  %p904_p5 = por %p903_p2, %p902_p8 }
  0x47   : > { %p905_p4 = pnand %p904_p5, %p898_p6 }
  0x49   : > { %908 = shalt.err (!%p905_p4)
}
  0x4a   : > { %s1001_s20 = smov 128   ;;  %s1002_s4 = smov 8  }
  0x4b   : > { %780 = dma.hbm_to_vmem [thread:$0]  (!%p1099_p0), %s1144_s19, 2048, %s1146_s26, %s164_s30, %s1001_s20, %s1001_s20, %s1002_s4  }
  0x4c   : > { %189 = sbr.rel (%p1137_p11) target bundleno = 360 (0x168), region = 28  ;;  %s1177_s6 = sand.u32 (!%p1137_p11), 1, %s979_s10  }
  0x4d   : > { %s685_s27 = sshll.u32 (!%p1137_p11), %s1177_s6, 6  ;;  %s192_s28 = scalar_lea.sflag (!%p1137_p11), [#allocation4], %s1177_s6 }
  0x4e   : > { %s1181_s29 = scalar_lea.vmem (!%p1137_p11), [#allocation3], %s685_s27  ;;  %p1309_p8 = scmp.ne.s32.totalorder (!%p1137_p11), %s1303_s21, 0 }
  0x53   : > { %962 = dma.done.wait (%p1309_p8), %s192_s28, 1024  }
  0x54   : > { %964 = vsyncadd (%p1309_p8), %s192_s28, 4294966272  ;;  %s686_s25 = sshll.u32 %s1177_s6, 7  ;;  %s201_s5 = scalar_lea.sflag [#allocation7], %s1177_s6 }
  0x55   : > { %s1191_s15 = scalar_lea.vmem [#allocation6], %s686_s25 }
  0x56   : > { %966 = dma.done.wait (%p1309_p8), %s201_s5, 2048  }
  0x57   : > { %968 = vsyncadd (%p1309_p8), %s201_s5, 4294965248  ;;  %v841_v0 = vld [vmem:[%s1181_s29] sm:$0xff]   ;;  %v842_v1 = vld [vmem:[%s1181_s29 + $0x8] sm:$0xff]   ;;  %s1223_s21 = scalar_lea.vmem [#allocation8], %s686_s25  ;;  %s703_s19 = sshll.u32 %s987_s12, 11 }
  0x58   : > { %720 = vmatprep.subr.bf16.mxu0 %v841_v0  ;;  %752 = vmatprep.subr.bf16.mxu1 %v841_v0  ;;  %v843_v2 = vld [vmem:[%s1181_s29 + $0x10] sm:$0xff]   ;;  %v844_v3 = vld [vmem:[%s1181_s29 + $0x18] sm:$0xff]   ;;  %v253_v4 = vld [vmem:[%s1191_s15] sm:$0xff]  ;;  %s558_s26 = sshll.u32 %s1223_s21, 4  ;;  %s1240_s3 = scalar_lea.hbm %s1299_s2, %s703_s19  ;;  %s1242_s26 = int_to_ptr.vmem [resolvable:$true] %s558_s26 }
  0x59   : > { %721 = vmatpush3.bf16.msra.mxu0 %v841_v0  ;;  %760 = vmatpush3.bf16.msra.mxu1 %v841_v0  ;;  %v254_v5 = vld [vmem:[%s1191_s15 + $0x8] sm:$0xff]  ;;  %v261_v6 = vld [vmem:[%s1191_s15 + $0x40] sm:$0xff]  ;;  %v847_v12 = vld [vmem:[%s1181_s29 + $0x30] sm:$0xff]   ;;  %s543_s7 = scalar_lea.sflag [#allocation5], %s1177_s6  ;;  %s909_s8 = scalar_lea.vmem %s1242_s26, 2048 }
  0x5a   : > { %722 = vmatprep.subr.bf16.mxu0 %v842_v1  ;;  %753 = vmatprep.subr.bf16.mxu1 %v842_v1  ;;  %v269_v7 = vpack.c.bf16 %v254_v5, %v253_v4  ;;  %v262_v8 = vld [vmem:[%s1191_s15 + $0x48] sm:$0xff]  ;;  %v845_v10 = vld [vmem:[%s1181_s29 + $0x20] sm:$0xff]   ;;  %v848_v13 = vld [vmem:[%s1181_s29 + $0x38] sm:$0xff]   ;;  %p910_p0 = scmp.ne.s32.totalorder %s1242_s26, %s909_s8  ;;  %p1310_p3 = scmp.ne.s32.totalorder %s1304_s22, 0 }
  0x5b   : > { %v273_v9 = vpack.c.bf16 %v262_v8, %v261_v6  ;;  %v846_v11 = vld [vmem:[%s1181_s29 + $0x28] sm:$0xff]   ;;  %v255_v14 = vld [vmem:[%s1191_s15 + $0x10] sm:$0xff]  ;;  %v256_v15 = vld [vmem:[%s1191_s15 + $0x18] sm:$0xff]  ;;  %s1003_s16 = smov [#allocation8]  }
  0x5c   : > { %736 = vmatprep.mubr.bf16.mxu0 %v269_v7  ;;  %v263_v16 = vld [vmem:[%s1191_s15 + $0x50] sm:$0xff]  ;;  %v264_v17 = vld [vmem:[%s1191_s15 + $0x58] sm:$0xff]  ;;  %v257_v18 = vld [vmem:[%s1191_s15 + $0x20] sm:$0xff]  ;;  %v270_v22 = vpack.c.bf16 %v256_v15, %v255_v14  ;;  %p911_p11 = pnand %p910_p0, %p1310_p3  ;;  %s913_s18 = sshll.u32 %s1003_s16, 4  ;;  %s914_s18 = int_to_ptr.vmem [resolvable:$false] %s913_s18 }
  0x5d   : > { %723 = vmatpush3.bf16.msra.mxu0 %v842_v1  ;;  %761 = vmatpush3.bf16.msra.mxu1 %v842_v1  ;;  %v258_v19 = vld [vmem:[%s1191_s15 + $0x28] sm:$0xff]  ;;  %v265_v20 = vld [vmem:[%s1191_s15 + $0x60] sm:$0xff]  ;;  %v274_v23 = vpack.c.bf16 %v264_v17, %v263_v16  ;;  %v259_v26 = vld [vmem:[%s1191_s15 + $0x30] sm:$0xff]  ;;  %s915_s20 = scalar_lea.vmem %s914_s18, 4096  ;;  %p916_p7 = scmp.lt.s32.totalorder %s1242_s26, %s914_s18 }
  0x5e   : > { %724 = vmatprep.subr.bf16.mxu0 %v843_v2  ;;  %754 = vmatprep.subr.bf16.mxu1 %v843_v2  ;;  %v266_v21 = vld [vmem:[%s1191_s15 + $0x68] sm:$0xff]  ;;  %v271_v24 = vpack.c.bf16 %v258_v19, %v257_v18  ;;  %v260_v27 = vld [vmem:[%s1191_s15 + $0x38] sm:$0xff]  ;;  %v267_v28 = vld [vmem:[%s1191_s15 + $0x70] sm:$0xff]  ;;  %p912_p13 = pneg %p911_p11  ;;  %p917_p10 = scmp.lt.s32.totalorder %s915_s20, %s909_s8 }
  0x5f   : > { %744 = vmatprep.mubr.bf16.mxu1 %v273_v9  ;;  %v275_v25 = vpack.c.bf16 %v266_v21, %v265_v20  ;;  %v268_v29 = vld [vmem:[%s1191_s15 + $0x78] sm:$0xff]  ;;  %v272_v30 = vpack.c.bf16 %v260_v27, %v259_v26 }
  0x60   : > { %v276_v31 = vpack.c.bf16 %v268_v29, %v267_v28  ;;  %p918_p12 = por %p917_p10, %p916_p7 }
  0x61   : > { %725 = vmatpush3.bf16.msra.mxu0 %v843_v2  ;;  %762 = vmatpush3.bf16.msra.mxu1 %v843_v2 }
  0x62   : > { %726 = vmatprep.subr.bf16.mxu0 %v844_v3  ;;  %755 = vmatprep.subr.bf16.mxu1 %v844_v3  ;;  %p919_p9 = pnand %p918_p12, %p912_p13 }
  0x65   : > { %727 = vmatpush3.bf16.msra.mxu0 %v844_v3  ;;  %763 = vmatpush3.bf16.msra.mxu1 %v844_v3 }
  0x66   : > { %728 = vmatprep.subr.bf16.mxu0 %v845_v10  ;;  %756 = vmatprep.subr.bf16.mxu1 %v845_v10 }
  0x69   : > { %729 = vmatpush3.bf16.msra.mxu0 %v845_v10  ;;  %764 = vmatpush3.bf16.msra.mxu1 %v845_v10 }
  0x6a   : > { %730 = vmatprep.subr.bf16.mxu0 %v846_v11  ;;  %757 = vmatprep.subr.bf16.mxu1 %v846_v11 }
  0x6d   : > { %731 = vmatpush3.bf16.msra.mxu0 %v846_v11  ;;  %765 = vmatpush3.bf16.msra.mxu1 %v846_v11 }
  0x6e   : > { %732 = vmatprep.subr.bf16.mxu0 %v847_v12  ;;  %758 = vmatprep.subr.bf16.mxu1 %v847_v12 }
  0x71   : > { %733 = vmatpush3.bf16.msra.mxu0 %v847_v12  ;;  %766 = vmatpush3.bf16.msra.mxu1 %v847_v12 }
  0x72   : > { %734 = vmatprep.subr.bf16.mxu0 %v848_v13  ;;  %759 = vmatprep.subr.bf16.mxu1 %v848_v13 }
  0x75   : > { %735 = vmatpush3.bf16.msra.mxu0 %v848_v13  ;;  %767 = vmatpush3.bf16.msra.mxu1 %v848_v13 }
  0x78   : > { %737 = vmatmul.mubr.bf16.vlgmr.msra.gmra.mrb[0].mxu0 %v270_v22  ;;  %745 = vmatmul.mubr.bf16.vlgmr.msra.gmra.mrb[0].mxu1 %v274_v23 }
  0x79   : > { %740 = vmatprep.mubr.bf16.mxu0 %v271_v24  ;;  %748 = vmatprep.mubr.bf16.mxu1 %v275_v25 }
  0x80   : > { %741 = vmatmul.mubr.bf16.gmra.mrb[4].mxu0 %v272_v30  ;;  %749 = vmatmul.mubr.bf16.gmra.mrb[4].mxu1 %v276_v31 }
 0x14b   : > { %v738_v32 = vpop.f32.mrb[0].mxu0  ;;  %v746_v33 = vpop.f32.mrb[0].mxu1 }
 0x14c   : > { %v512_v34 = vmax.f32 %v738_v32, 0.0  ;;  %v520_v35 = vmax.f32 %v746_v33, 0.0  ;;  %v396_v36 = vpop.f32.mrb[1].mxu0  ;;  %v428_v37 = vpop.f32.mrb[1].mxu1 }
 0x14d   : > { %v510_v38 = vmax.f32 %v396_v36, 0.0  ;;  %v518_v39 = vmax.f32 %v428_v37, 0.0  ;;  %v739_v40 = vpop.f32.mrb[2].mxu0  ;;  %v747_v41 = vpop.f32.mrb[2].mxu1 }
 0x14e   : > { %528 = vst [vmem:[%s1223_s21 + $0x10] sm:$0xff] %v512_v34  ;;  %536 = vst [vmem:[%s1223_s21 + $0x50] sm:$0xff] %v520_v35  ;;  %v513_v42 = vmax.f32 %v739_v40, 0.0  ;;  %v521_v43 = vmax.f32 %v747_v41, 0.0  ;;  %v399_v44 = vpop.f32.mrb[3].mxu0  ;;  %v431_v45 = vpop.f32.mrb[3].mxu1 }
 0x14f   : > { %526 = vst [vmem:[%s1223_s21] sm:$0xff] %v510_v38  ;;  %534 = vst [vmem:[%s1223_s21 + $0x40] sm:$0xff] %v518_v39  ;;  %v511_v46 = vmax.f32 %v399_v44, 0.0  ;;  %v519_v47 = vmax.f32 %v431_v45, 0.0 }
 0x150   : > { %529 = vst [vmem:[%s1223_s21 + $0x18] sm:$0xff] %v513_v42  ;;  %537 = vst [vmem:[%s1223_s21 + $0x58] sm:$0xff] %v521_v43 }
 0x151   : > { %527 = vst [vmem:[%s1223_s21 + $0x8] sm:$0xff] %v511_v46  ;;  %535 = vst [vmem:[%s1223_s21 + $0x48] sm:$0xff] %v519_v47 }
 0x153   : > { %v742_v48 = vpop.f32.mrb[4].mxu0  ;;  %v750_v49 = vpop.f32.mrb[4].mxu1 }
 0x154   : > { %v516_v50 = vmax.f32 %v742_v48, 0.0  ;;  %v524_v51 = vmax.f32 %v750_v49, 0.0  ;;  %v412_v52 = vpop.f32.mrb[5].mxu0  ;;  %v444_v53 = vpop.f32.mrb[5].mxu1 }
 0x155   : > { %v514_v54 = vmax.f32 %v412_v52, 0.0  ;;  %v522_v55 = vmax.f32 %v444_v53, 0.0  ;;  %v743_v56 = vpop.f32.mrb[6].mxu0  ;;  %v751_v57 = vpop.f32.mrb[6].mxu1 }
 0x156   : > { %532 = vst [vmem:[%s1223_s21 + $0x30] sm:$0xff] %v516_v50  ;;  %540 = vst [vmem:[%s1223_s21 + $0x70] sm:$0xff] %v524_v51  ;;  %v517_v58 = vmax.f32 %v743_v56, 0.0  ;;  %v525_v59 = vmax.f32 %v751_v57, 0.0  ;;  %v415_v60 = vpop.f32.mrb[7].mxu0  ;;  %v447_v61 = vpop.f32.mrb[7].mxu1 }
 0x157   : > { %530 = vst [vmem:[%s1223_s21 + $0x20] sm:$0xff] %v514_v54  ;;  %538 = vst [vmem:[%s1223_s21 + $0x60] sm:$0xff] %v522_v55  ;;  %v515_v62 = vmax.f32 %v415_v60, 0.0  ;;  %v523_v63 = vmax.f32 %v447_v61, 0.0 }
 0x158   : > { %533 = vst [vmem:[%s1223_s21 + $0x38] sm:$0xff] %v517_v58  ;;  %541 = vst [vmem:[%s1223_s21 + $0x78] sm:$0xff] %v525_v59 }
 0x159   : > { %531 = vst [vmem:[%s1223_s21 + $0x28] sm:$0xff] %v515_v62  ;;  %539 = vst [vmem:[%s1223_s21 + $0x68] sm:$0xff] %v523_v63 }
 0x15a   : > { %922 = shalt.err (!%p919_p9)
}
 0x15b   : > { %s923_s4 = scalar_lea.hbm %s1240_s3, 2048  ;;  %s927_s29 = scalar_lea.hbm %s1299_s2, 4096 }
 0x15c   : > { %p924_p1 = scmp.ne.s32.totalorder %s1240_s3, %s923_s4  ;;  %p928_p5 = scmp.lt.u32.totalorder %s1240_s3, %s1299_s2 }
 0x15d   : > { %p929_p4 = scmp.lt.u32.totalorder %s927_s29, %s923_s4  ;;  %p931_p0 = scmp.lt.u32.totalorder %s923_s4, %s1240_s3 }
 0x15e   : > { %p925_p6 = pnand %p924_p1, %p1310_p3 }
 0x15f   : > { %p930_p8 = por %p929_p4, %p928_p5 }
 0x160   : > { %p926_p2 = pneg %p925_p6 }
 0x161   : > { %p932_p11 = por %p931_p0, %p930_p8 }
 0x163   : > { %p933_p13 = pnand %p932_p11, %p926_p2 }
 0x165   : > { %936 = shalt.err (!%p933_p13)
}
 0x166   : > { %s1004_s15 = smov 128   ;;  %s1005_s21 = smov 8  }
 0x167   : > { %772 = dma.vmem_to_hbm [thread:$0]  (%p1310_p3), %s1242_s26, 2048, %s1240_s3, %s543_s7, %s1004_s15, %s1004_s15, %s1005_s21  }
 0x168 PF: > { %s573_s19 = sand.u32 1, %s975_s9   ;;  %p1311_p7 = scmp.ne.s32.totalorder %s1305_s24, 0 }
 0x169   : > { %p1312_p10 = scmp.ge.s32.totalorder %s995_s14, 2  ;;  %s574_s12 = scalar_lea.sflag [#allocation5], %s573_s19 }
 0x16b   : > { %p782_p12 = pnand %p1312_p10, %p1311_p7 }
 0x16d   : > { %970 = dma.done.wait (!%p782_p12), %s574_s12, 2048  }
 0x16e   : > { %972 = vsyncadd (!%p782_p12), %s574_s12, 4294965248  ;;  %s21_s14 = sadd.s32 1, %s995_s14   ;;  %s1313_s9 = smov %s979_s10 }
 0x16f   : > { %p18_p9 = scmp.ge.s32.totalorder %s21_s14, 4   ;;  %s1314_s10 = smov %s983_s11 }
 0x170   : > { %s1315_s11 = smov %s1077_s23  ;;  %s1316_s12 = smov %s991_s13 }
 0x171   : > { %s1317_s13 = smov %s1319_s17  ;;  %20 = sbr.rel (!%p18_p9) target bundleno = 8 (0x8), region = 95 }
 0x178   :  { %579 = vsyncpa [#allocation4], 1 }
 0x179   :  { %581 = vsyncpa [#allocation4 + $0x1], 1 }
 0x17a   :  { %582 = vsyncpa [#allocation7], 1 }
 0x17b   :  { %584 = vsyncpa [#allocation7 + $0x1], 1 }
 0x17c   :  { %585 = vsyncpa [#allocation5], 1 }
 0x17d   :  { %587 = vsyncpa [#allocation5 + $0x1], 1 }

</bundles_post_ra>
